<compile_context>
chip_gen: v6e
topology: v6e:2x2x1
jax: 0.10.0
libtpu: 0.0.40
codegen_flags: <defaults>
</compile_context>

<pallas_src>
import math

import jax
import jax.numpy as jnp
from jax.experimental import pallas as pl
from jax.experimental.pallas import tpu as pltpu

BN_EPS = 1e-5

_VMEM_LIMIT = None


def _vmem_limit():
    """Per-generation scoped-VMEM request: <= 3/4 of physical, capped at 96 MiB."""
    global _VMEM_LIMIT
    if _VMEM_LIMIT is None:
        try:
            cap = int(pltpu.get_tpu_info().vmem_capacity_bytes)
        except Exception:
            cap = 64 * 1024 * 1024
        _VMEM_LIMIT = int(min(cap * 3 // 4, 96 * 1024 * 1024))
    return _VMEM_LIMIT


def _round_up(n, m):
    return (n + m - 1) // m * m


# --------------- fused matmul (+BN shift, +residual, +ReLU) ---------------

def _make_mm_kernel(relu, residual):
    """out = act(A @ W + shift [+ residual]); single full-K step, f32 accumulate."""
    def kernel(*refs):
        if residual:
            a_ref, w_ref, b_ref, r_ref, o_ref = refs
        else:
            a_ref, w_ref, b_ref, o_ref = refs
        out = jnp.dot(a_ref[...], w_ref[...], preferred_element_type=jnp.float32)
        out = out + b_ref[...]
        if residual:
            out = out + r_ref[...].astype(jnp.float32)
        if relu:
            out = jnp.maximum(out, 0.0)
        o_ref[...] = out.astype(o_ref.dtype)
    return kernel


def matmul_bn_act(a, w, shift, residual=None, relu=False, out_dtype=jnp.bfloat16):
    """a: (M, K) -> (M, N).  w: (K, N) bf16 (BN scale pre-folded), shift: (1, N) f32."""
    M, K = a.shape
    K2, Np = w.shape
    assert K == K2, (K, K2)
    a = a.astype(jnp.bfloat16)

    # M tiling: full extent for small M, else the largest 8-multiple divisor <= 512.
    Mp = M
    if M <= 512:
        tm = M
    else:
        tm = next((c for c in range(512, 0, -8) if M % c == 0), None)
        if tm is None:                      # ragged fallback (not hit in practice)
            tm = 256
            Mp = _round_up(M, tm)
    # N tiling: lane-dense 256-wide tiles when possible, else full extent.
    tn = min(Np, 256) if Np % 128 == 0 else Np
    # Expose >=2 parallel grid blocks so both v7x TensorCores get work.
    if Mp // tm == 1 and Np // tn == 1:
        if Np % 256 == 0:
            tn = Np // 2
        elif M >= 16 and M % 16 == 0:
            tm = M // 2

    if Mp != M:
        a = jnp.pad(a, ((0, Mp - M), (0, 0)))

    inputs = [a, w, shift]
    in_specs = [
        pl.BlockSpec((tm, K), lambda i, j: (i, 0)),
        pl.BlockSpec((K, tn), lambda i, j: (0, j)),
        pl.BlockSpec((1, tn), lambda i, j: (0, j)),
    ]
    if residual is not None:
        r = residual.astype(jnp.bfloat16)
        if Mp != M:
            r = jnp.pad(r, ((0, Mp - M), (0, 0)))
        inputs.append(r)
        in_specs.append(pl.BlockSpec((tm, tn), lambda i, j: (i, j)))

    out = pl.pallas_call(
        _make_mm_kernel(relu, residual is not None),
        out_shape=jax.ShapeDtypeStruct((Mp, Np), out_dtype),
        grid_spec=pltpu.PrefetchScalarGridSpec(
            num_scalar_prefetch=0,
            grid=(Mp // tm, Np // tn),
            in_specs=in_specs,
            out_specs=pl.BlockSpec((tm, tn), lambda i, j: (i, j)),
        ),
        compiler_params=pltpu.CompilerParams(
            dimension_semantics=("parallel", "parallel"),
            vmem_limit_bytes=_vmem_limit()),
    )(*inputs)
    return out[:M] if Mp != M else out


# --------------- implicit (shift-GEMM) 3x3 stride-1 convolution ---------------

def _make_shift_conv_kernel(relu, residual, taps, mrows):
    """9 row-shifted slices of the VMEM-resident flattened padded image, each
    matmul'd against its (C, Cout) tap weight and accumulated in f32."""
    def kernel(*refs):
        if residual:
            x_ref, w_ref, b_ref, r_ref, o_ref = refs
        else:
            x_ref, w_ref, b_ref, o_ref = refs
        acc = jnp.dot(x_ref[0, taps[0]:taps[0] + mrows, :], w_ref[0],
                      preferred_element_type=jnp.float32)
        for t in range(1, len(taps)):
            off = taps[t]
            acc = acc + jnp.dot(x_ref[0, off:off + mrows, :], w_ref[t],
                                preferred_element_type=jnp.float32)
        out = acc + b_ref[...]
        if residual:
            out = out + r_ref[0].astype(jnp.float32)
        if relu:
            out = jnp.maximum(out, 0.0)
        o_ref[0] = out.astype(o_ref.dtype)
    return kernel


def conv3x3_s1_bn_act(x, conv, relu=False, residual=None):
    """3x3 stride-1 pad-1 conv + folded BN (+residual, +ReLU), no im2col in HBM."""
    N, H, W, C = x.shape
    assert conv['khw'] == (3, 3) and conv['stride'] == 1 and conv['pad'] == 1
    assert C == conv['cin'], (C, conv['cin'])
    OH, OW = H, W
    Hp, Wp = H + 3, W + 2          # 1 top + 2 bottom rows, 1 left + 1 right col
    R = Hp * Wp
    mrows = OH * Wp                # output rows incl. 2 garbage columns per row
    Cout = conv['cout']
    ctile = 256 if Cout % 256 == 0 else Cout
    taps = tuple(i * Wp + j for i in range(3) for j in range(3))

    xp = jnp.pad(x.astype(jnp.bfloat16),
                 ((0, 0), (1, 2), (1, 1), (0, 0))).reshape(N, R, C)
    inputs = [xp, conv['w'], conv['shift']]
    in_specs = [
        pl.BlockSpec((1, R, C), lambda n, c: (n, 0, 0)),
        pl.BlockSpec((9, C, ctile), lambda n, c: (0, 0, c)),
        pl.BlockSpec((1, ctile), lambda n, c: (0, c)),
    ]
    if residual is not None:
        r = jnp.pad(residual.astype(jnp.bfloat16),
                    ((0, 0), (0, 0), (0, Wp - OW), (0, 0))).reshape(N, mrows, Cout)
        inputs.append(r)
        in_specs.append(pl.BlockSpec((1, mrows, ctile), lambda n, c: (n, 0, c)))

    out = pl.pallas_call(
        _make_shift_conv_kernel(relu, residual is not None, taps, mrows),
        out_shape=jax.ShapeDtypeStruct((N, mrows, Cout), jnp.bfloat16),
        grid_spec=pltpu.PrefetchScalarGridSpec(
            num_scalar_prefetch=0,
            grid=(N, Cout // ctile),
            in_specs=in_specs,
            out_specs=pl.BlockSpec((1, mrows, ctile), lambda n, c: (n, 0, c)),
        ),
        compiler_params=pltpu.CompilerParams(
            dimension_semantics=("parallel", "parallel"),
            vmem_limit_bytes=_vmem_limit()),
    )(*inputs)
    # Drop the 2 garbage columns per output row (wrap-around reads).
    return out.reshape(N, OH, Wp, Cout)[:, :, :OW, :]


# --------------------------------- maxpool ---------------------------------

def _maxpool_kernel(ee_ref, eo_ref, oe_ref, oo_ref, o_ref):
    oh, ow = o_ref.shape[1], o_ref.shape[2]
    m = ee_ref[0]
    m = jnp.maximum(m, eo_ref[0, :, 0:ow, :])
    m = jnp.maximum(m, eo_ref[0, :, 1:ow + 1, :])
    m = jnp.maximum(m, oe_ref[0, 0:oh, :, :])
    m = jnp.maximum(m, oe_ref[0, 1:oh + 1, :, :])
    m = jnp.maximum(m, oo_ref[0, 0:oh, 0:ow, :])
    m = jnp.maximum(m, oo_ref[0, 0:oh, 1:ow + 1, :])
    m = jnp.maximum(m, oo_ref[0, 1:oh + 1, 0:ow, :])
    m = jnp.maximum(m, oo_ref[0, 1:oh + 1, 1:ow + 1, :])
    o_ref[0] = m


def maxpool_3x3_s2(x):
    """MaxPool2d(kernel_size=3, stride=2, padding=1) on NHWC bf16, H/W even."""
    N, H, W, C = x.shape
    assert H % 2 == 0 and W % 2 == 0
    OH, OW = H // 2, W // 2
    neg = float(jnp.finfo(jnp.bfloat16).min)
    # Even/odd parity split (cheap XLA slices, ~1x traffic) so the kernel only
    # needs unit-stride shifted reads (no 9x HBM window stack).
    ee = x[:, 0::2, 0::2, :]
    eo = jnp.pad(x[:, 0::2, 1::2, :], ((0, 0), (0, 0), (1, 0), (0, 0)),
                 constant_values=neg)
    oe = jnp.pad(x[:, 1::2, 0::2, :], ((0, 0), (1, 0), (0, 0), (0, 0)),
                 constant_values=neg)
    oo = jnp.pad(x[:, 1::2, 1::2, :], ((0, 0), (1, 0), (1, 0), (0, 0)),
                 constant_values=neg)
    return pl.pallas_call(
        _maxpool_kernel,
        out_shape=jax.ShapeDtypeStruct((N, OH, OW, C), x.dtype),
        grid_spec=pltpu.PrefetchScalarGridSpec(
            num_scalar_prefetch=0,
            grid=(N,),
            in_specs=[
                pl.BlockSpec((1, OH, OW, C), lambda n: (n, 0, 0, 0)),
                pl.BlockSpec((1, OH, OW + 1, C), lambda n: (n, 0, 0, 0)),
                pl.BlockSpec((1, OH + 1, OW, C), lambda n: (n, 0, 0, 0)),
                pl.BlockSpec((1, OH + 1, OW + 1, C), lambda n: (n, 0, 0, 0)),
            ],
            out_specs=pl.BlockSpec((1, OH, OW, C), lambda n: (n, 0, 0, 0)),
        ),
        compiler_params=pltpu.CompilerParams(
            dimension_semantics=("parallel",),
            vmem_limit_bytes=_vmem_limit()),
    )(ee, eo, oe, oo)


# ------------------------- conv / block / model glue -------------------------

def conv_bn_act(x, conv, relu=False, residual=None):
    """Generic Conv2d(bias=False) + folded BN (+residual, +ReLU) via im2col +
    one fused Pallas matmul.  Used only for the stem, the stride-2 3x3 convs
    and the 1x1 downsamples (stride-1 3x3 convs use conv3x3_s1_bn_act)."""
    # TODO(synk): these few stride-2 convs still materialize a KH*KW-expanded
    #   im2col activation in HBM; the dominant stride-1 3x3 path avoids it.
    N, H, W, C = x.shape
    KH, KW = conv['khw']
    stride, pad = conv['stride'], conv['pad']
    assert C == conv['cin'], (C, conv['cin'])
    OH = (H + 2 * pad - KH) // stride + 1
    OW = (W + 2 * pad - KW) // stride + 1
    xp = x if pad == 0 else jnp.pad(x, ((0, 0), (pad, pad), (pad, pad), (0, 0)))
    patches = [xp[:, i:i + stride * OH:stride, j:j + stride * OW:stride, :]
               for i in range(KH) for j in range(KW)]
    if len(patches) == 1:
        a = patches[0].reshape(N * OH * OW, C)
    else:
        a = jnp.concatenate(patches, axis=-1).reshape(N * OH * OW, KH * KW * C)
    res = None if residual is None else residual.reshape(N * OH * OW, -1)
    w2d = conv['w'].reshape(KH * KW * C, conv['cout'])
    out = matmul_bn_act(a, w2d, conv['shift'], residual=res, relu=relu,
                        out_dtype=jnp.bfloat16)
    return out.reshape(N, OH, OW, conv['cout'])


def basic_block(x, blk):
    if 'down' in blk:
        identity = conv_bn_act(x, blk['down'], relu=False)
    else:
        identity = x
    if blk['conv1']['stride'] == 1:
        out = conv3x3_s1_bn_act(x, blk['conv1'], relu=True)
    else:
        out = conv_bn_act(x, blk['conv1'], relu=True)
    out = conv3x3_s1_bn_act(out, blk['conv2'], relu=True, residual=identity)
    return out


def fc_forward(x, fc):
    return matmul_bn_act(x, fc['w'], fc['shift'], relu=False,
                         out_dtype=jnp.float32)


def resnet_forward(params, x_nchw):
    x = jnp.transpose(x_nchw, (0, 2, 3, 1)).astype(jnp.bfloat16)  # NCHW->NHWC
    x = conv_bn_act(x, params['stem'], relu=True)
    x = maxpool_3x3_s2(x)
    for stage in params['layers']:
        for blk in stage:
            x = basic_block(x, blk)
    x = jnp.mean(x.astype(jnp.float32), axis=(1, 2))  # AdaptiveAvgPool2d((1,1))
    return fc_forward(x, params['fc'])


# ------------------------- parameter prep / init -------------------------

def prep_conv(w_oihw, stride, pad):
    """Pack conv weight as (KH*KW, Cin, Cout) bf16 with the identity-init
    eval-mode BatchNorm scale (1/sqrt(1+eps)) folded in; shift stays f32."""
    cout, cin, kh, kw = w_oihw.shape
    scale = 1.0 / math.sqrt(1.0 + BN_EPS)
    w = (jnp.transpose(w_oihw, (2, 3, 1, 0)) * scale).reshape(kh * kw, cin, cout)
    return dict(w=w.astype(jnp.bfloat16),
                shift=jnp.zeros((1, cout), jnp.float32),
                khw=(kh, kw), stride=stride, pad=pad, cin=cin, cout=cout)


def prep_fc(fc_w, fc_b):
    nc, _ = fc_w.shape
    return dict(w=fc_w.T.astype(jnp.bfloat16),
                shift=fc_b.reshape(1, nc).astype(jnp.float32))


def init_params(key, layers=(1, 1, 1, 1), num_classes=10):
    def kaiming(k, cout, cin, kh, kw):
        fan_out = cout * kh * kw  # kaiming_normal_, mode='fan_out', relu
        std = math.sqrt(2.0 / fan_out)
        return std * jax.random.normal(k, (cout, cin, kh, kw), jnp.float32)

    keys = iter(jax.random.split(key, 128))
    params = {'stem': prep_conv(kaiming(next(keys), 64, 3, 7, 7), stride=2, pad=3)}
    inplanes = 64
    stages = []
    for planes, nblocks, stride in zip([64, 128, 256, 512], layers, [1, 2, 2, 2]):
        blocks = []
        for bi in range(nblocks):
            st = stride if bi == 0 else 1
            blk = {
                'conv1': prep_conv(kaiming(next(keys), planes, inplanes, 3, 3),
                                   stride=st, pad=1),
                'conv2': prep_conv(kaiming(next(keys), planes, planes, 3, 3),
                                   stride=1, pad=1),
            }
            if st != 1 or inplanes != planes:  # downsample: conv1x1 + its own BN
                blk['down'] = prep_conv(kaiming(next(keys), planes, inplanes, 1, 1),
                                        stride=st, pad=0)
            blocks.append(blk)
            inplanes = planes
        stages.append(blocks)
    params['layers'] = stages
    fan_in = 512  # 512 * BasicBlock.expansion
    bound = 1.0 / math.sqrt(fan_in)
    fc_w = jax.random.uniform(next(keys), (num_classes, fan_in),
                              jnp.float32, -bound, bound)
    fc_b = jax.random.uniform(next(keys), (num_classes,),
                              jnp.float32, -bound, bound)
    params['fc'] = prep_fc(fc_w, fc_b)
    return params


if __name__ == "__main__":
    key = jax.random.PRNGKey(0)
    pkey, xkey = jax.random.split(key)
    # Small ResNet (BasicBlock, layers=[1,1,1,1]), num_classes=10.
    params = init_params(pkey, layers=(1, 1, 1, 1), num_classes=10)
    # Input is PyTorch-convention NCHW: (batch=2, channels=3, 32, 32).
    x = jax.random.normal(xkey, (2, 3, 32, 32), jnp.float32)
    logits = resnet_forward(params, x)
    jax.block_until_ready(logits)
    assert logits.shape == (2, 10)
    assert bool(jnp.all(jnp.isfinite(logits)))
    print("KERNEL_OK")
</pallas_src>

<mosaic_0001>
module attributes {stable_mosaic.version = 11 : i64} {
  func.func @kernel(%arg0: i32, %arg1: i32, %arg2: memref<256x147xbf16, #tpu.memory_space<vmem>>, %arg3: memref<147x64xbf16, #tpu.memory_space<vmem>>, %arg4: memref<1x64xf32, #tpu.memory_space<vmem>>, %arg5: memref<256x64xbf16, #tpu.memory_space<vmem>>) attributes {dimension_semantics = [#tpu.dimension_semantics<parallel>, #tpu.dimension_semantics<parallel>], iteration_bounds = array<i64: 2, 1>, scalar_prefetch = 0 : i64, scratch_operands = 0 : i64, tpu.core_type = #tpu.core_type<tc>, window_params = [{transform_indices = @transform_0, window_bounds = array<i64: 256, 147>}, {transform_indices = @transform_1, window_bounds = array<i64: 147, 64>}, {transform_indices = @transform_2, window_bounds = array<i64: 1, 64>}, {transform_indices = @transform_3, window_bounds = array<i64: 256, 64>}]} {
    %c0 = arith.constant 0 : index
    %c0_0 = arith.constant 0 : index
    %0 = vector.load %arg2[%c0, %c0_0] : memref<256x147xbf16, #tpu.memory_space<vmem>>, vector<256x147xbf16>
    %c0_1 = arith.constant 0 : index
    %c0_2 = arith.constant 0 : index
    %1 = vector.load %arg3[%c0_1, %c0_2] : memref<147x64xbf16, #tpu.memory_space<vmem>>, vector<147x64xbf16>
    %cst = arith.constant dense<0.000000e+00> : vector<256x64xf32>
    %2 = tpu.matmul %0, %1, %cst {dimension_numbers = #tpu.dot_dimension_numbers<[1], [0], [0], [1], [0, 0, 1, 1], [], []>} : vector<256x147xbf16>, vector<147x64xbf16>, vector<256x64xf32> -> vector<256x64xf32>
    %c0_3 = arith.constant 0 : index
    %c0_4 = arith.constant 0 : index
    %3 = vector.load %arg4[%c0_3, %c0_4] : memref<1x64xf32, #tpu.memory_space<vmem>>, vector<1x64xf32>
    %4 = vector.broadcast %3 : vector<1x64xf32> to vector<256x64xf32>
    %5 = arith.addf %2, %4 : vector<256x64xf32>
    %cst_5 = arith.constant 0.000000e+00 : f32
    %6 = vector.broadcast %cst_5 : f32 to vector<256x64xf32>
    %7 = arith.maximumf %5, %6 : vector<256x64xf32>
    %8 = arith.truncf %7 : vector<256x64xf32> to vector<256x64xbf16>
    %c0_6 = arith.constant 0 : index
    %c0_7 = arith.constant 0 : index
    %9 = vector.load %arg5[%c0_6, %c0_7] : memref<256x64xbf16, #tpu.memory_space<vmem>>, vector<256x64xbf16>
    tpu.vector_store %arg5[%c0_6, %c0_7], %8 {strides = array<i32>} : memref<256x64xbf16, #tpu.memory_space<vmem>>, vector<256x64xbf16>,
    return
  }
  func.func @transform_0(%arg0: i32, %arg1: i32) -> (i32, i32) {
    %c0_i32 = arith.constant 0 : i32
    %c0_i32_0 = arith.constant 0 : i32
    return %arg0, %c0_i32 : i32, i32
  }
  func.func @transform_1(%arg0: i32, %arg1: i32) -> (i32, i32) {
    %c0_i32 = arith.constant 0 : i32
    %c0_i32_0 = arith.constant 0 : i32
    return %c0_i32, %arg1 : i32, i32
  }
  func.func @transform_2(%arg0: i32, %arg1: i32) -> (i32, i32) {
    %c0_i32 = arith.constant 0 : i32
    %c0_i32_0 = arith.constant 0 : i32
    return %c0_i32, %arg1 : i32, i32
  }
  func.func @transform_3(%arg0: i32, %arg1: i32) -> (i32, i32) {
    %c0_i32 = arith.constant 0 : i32
    return %arg0, %arg1 : i32, i32
  }
}

</mosaic_0001>

<bundles_post_ra>
// kernel: tpu_custom_call.1
= control target key start
LH: loop header
LB: loop body
LE: loop exit
PB: predicated region body
PF: predicated region fallthrough
CT: control target
= control target key end

     0   :  { %s1288_s12 = smov 0   ;;  %s1290_s13 = smov 0   ;;  %s1508_s0 = inlined_call_operand.vmem [shape: bf16[512,147], index: 0, kind: input, shape index: {}]   ;;  %s1509_s1 = inlined_call_operand.vmem [shape: bf16[147,64], index: 1, kind: input, shape index: {}]   ;;  %s1510_s2 = inlined_call_operand.vmem [shape: f32[1,64], index: 2, kind: input, shape index: {}]   ;;  %s1511_s3 = inlined_call_operand.vmem [shape: bf16[512,64], index: 3, kind: output, shape index: {}]  }
   0x1   :  { %s1292_s14 = smov 0  }
   0x2 LB: > { %s25_s15 = sadd.s32 1, %s1260_s13  ;;  %p1006_p0 = scmp.ge.s32.totalorder %s1264_s14, 1  ;;  %s1264_s14 = sphi %s1292_s14, %s13_s14   ;;  %s1260_s13 = sphi %s1290_s13, %s1513_s13   ;;  %s1256_s12 = sphi %s1288_s12, %s1512_s12  }
   0x3   : > { %p27_p1 = scmp.ge.s32.totalorder %s25_s15, 2  ;;  %p170_p2 = scmp.lt.s32.totalorder %s1264_s14, 3 }
   0x5   : > { %s1515_s15 = smov (%p27_p1, %s25_s15), 0  ;;  %p171_p3 = pnand %p1006_p0, %p170_p2 }
   0x6   : > { %s1007_s22 = sshll.u32 (!%p171_p3), %s1256_s12, 5 }
   0x7   : > { %174 = sbr.rel (%p171_p3) target bundleno = 313 (0x139), region = 32  ;;  %p206_p4 = scmp.lt.s32.totalorder (!%p171_p3), %s1007_s22, 63 }
   0xc   : > { %v1184_v0 = vld [vmem:[%s1509_s1 + $0x38] sm:$0xff]   ;;  %v1266_v1 = vmov 0   ;;  %v1185_v2 = vld [vmem:[%s1509_s1 + $0x30] sm:$0xff]   ;;  %v1186_v3 = vld [vmem:[%s1509_s1 + $0x28] sm:$0xff]   ;;  %s1517_s22 = smov (!%p206_p4, %s1007_s22), 63  ;;  %vm488_vm0 = vcmask 154624  }
   0xd   : > { %544 = vmatprep.subr.bf16.mxu0 %v1266_v1  ;;  %1138 = vmatprep.subr.bf16.mxu1 %v1266_v1  ;;  %v1187_v4 = vld [vmem:[%s1509_s1 + $0x20] sm:$0xff]   ;;  %s1105_s25 = sshll.u32 %s1517_s22, 3  ;;  %v1188_v5 = vld [vmem:[%s1509_s1 + $0x18] sm:$0xff]   ;;  %v1189_v8 = vld [vmem:[%s1509_s1 + $0x10] sm:$0xff]   ;;  %vm537_vm1 = vcmask 1040384   ;;  %vm538_vm2 = vcmask 1041408  }
   0xe   : > { %545 = vmatpush1.bf16.msra.mxu0 %v1184_v0  ;;  %1148 = vmatpush1.bf16.msra.mxu1 %v1184_v0  ;;  %s1324_s28 = scalar_lea.vmem %s1508_s0, %s1105_s25  ;;  %v1190_v9 = vld [vmem:[%s1509_s1 + $0x8] sm:$0xff]   ;;  %v1267_v10 = vmov 65535   ;;  %v1191_v12 = vld [vmem:[%s1509_s1] sm:$0xff]   ;;  %s1011_s19 = sshll.u32 %s1517_s22, 2  ;;  %vm865_vm3 = vcmask 519168  }
   0xf   : > { %546 = vmatprep.subr.bf16.mxu0 %v1266_v1  ;;  %1139 = vmatprep.subr.bf16.mxu1 %v1266_v1  ;;  %v1196_v6 = vld [vmem:[%s1324_s28 + $0x4] ss:$8 sps:$4 sm:$0xff]   ;;  %v539_v11 = vsel %vm537_vm1, 4294967295, %v1267_v10  ;;  %v1192_v13 = vld [vmem:[%s1509_s1 + $0x48] ss:$0 sps:$4 sm:$0x33]   ;;  %s1403_s23 = scalar_lea.vmem %s1511_s3, %s1011_s19 }
  0x10   : > { %v1199_v7 = vld [vmem:[%s1324_s28 + $0x84] ss:$8 sps:$4 sm:$0xff]   ;;  %1055 = vmatprep.mubr.msk.bf16.mxu0 %vm488_vm0, %v1196_v6  ;;  %v540_v14 = vsel %vm538_vm2, %v539_v11, 0  ;;  %v1194_v17 = vld [vmem:[%s1324_s28] ss:$8 sps:$4 sm:$0xff]  }
  0x11   : > { %1063 = vmatprep.mubr.msk.bf16.mxu1 %vm488_vm0, %v1199_v7  ;;  %v542_v15 = vand.u32 %v1192_v13, %v540_v14  ;;  %v1193_v16 = vld [vmem:[%s1509_s1 + $0x40] sm:$0xff]   ;;  %v1200_v19 = vld [vmem:[%s1324_s28 + $0x14] ss:$8 sps:$4 sm:$0xff]   ;;  %v1204_v21 = vld [vmem:[%s1324_s28 + $0x10] ss:$8 sps:$4 sm:$0xff]  }
  0x12   : > { %547 = vmatpush1.bf16.msra.mxu0 %v1185_v2  ;;  %1149 = vmatpush1.bf16.msra.mxu1 %v1185_v2  ;;  %v1197_v18 = vld [vmem:[%s1324_s28 + $0x80] ss:$8 sps:$4 sm:$0xff]   ;;  %v1202_v20 = vld [vmem:[%s1324_s28 + $0x94] ss:$8 sps:$4 sm:$0xff]   ;;  %v1205_v22 = vld [vmem:[%s1324_s28 + $0x90] ss:$8 sps:$4 sm:$0xff]  }
  0x13   : > { %548 = vmatprep.subr.bf16.mxu0 %v1266_v1  ;;  %1140 = vmatprep.subr.bf16.mxu1 %v1266_v1  ;;  %v1206_v23 = vld [vmem:[%s1324_s28 + $0x24] ss:$8 sps:$4 sm:$0xff]   ;;  %v1210_v25 = vld [vmem:[%s1324_s28 + $0x20] ss:$8 sps:$4 sm:$0xff]   ;;  %v1212_v27 = vld [vmem:[%s1324_s28 + $0x34] ss:$8 sps:$4 sm:$0xff]  }
  0x14   : > { %v1208_v24 = vld [vmem:[%s1324_s28 + $0xa4] ss:$8 sps:$4 sm:$0xff]   ;;  %v1211_v26 = vld [vmem:[%s1324_s28 + $0xa0] ss:$8 sps:$4 sm:$0xff]   ;;  %v1214_v28 = vld [vmem:[%s1324_s28 + $0xb4] ss:$8 sps:$4 sm:$0xff]  }
  0x15   : > { %v1216_v29 = vld [vmem:[%s1324_s28 + $0x30] ss:$8 sps:$4 sm:$0xff]   ;;  %v1218_v31 = vld [vmem:[%s1324_s28 + $0x44] ss:$8 sps:$4 sm:$0xff]   ;;  %v1222_v33 = vld [vmem:[%s1324_s28 + $0x40] ss:$8 sps:$4 sm:$0xff]  }
  0x16   : > { %549 = vmatpush1.bf16.msra.mxu0 %v1186_v3  ;;  %1150 = vmatpush1.bf16.msra.mxu1 %v1186_v3  ;;  %v1217_v30 = vld [vmem:[%s1324_s28 + $0xb0] ss:$8 sps:$4 sm:$0xff]   ;;  %v1220_v32 = vld [vmem:[%s1324_s28 + $0xc4] ss:$8 sps:$4 sm:$0xff]   ;;  %v1223_v34 = vld [vmem:[%s1324_s28 + $0xc0] ss:$8 sps:$4 sm:$0xff]  }
  0x17   : > { %550 = vmatprep.subr.bf16.mxu0 %v1266_v1  ;;  %1141 = vmatprep.subr.bf16.mxu1 %v1266_v1  ;;  %v1224_v35 = vld [vmem:[%s1324_s28 + $0x54] ss:$8 sps:$4 sm:$0xff]   ;;  %v1228_v37 = vld [vmem:[%s1324_s28 + $0x50] ss:$8 sps:$4 sm:$0xff]   ;;  %v1230_v39 = vld [vmem:[%s1324_s28 + $0x64] ss:$8 sps:$4 sm:$0xff]  }
  0x18   : > { %v1226_v36 = vld [vmem:[%s1324_s28 + $0xd4] ss:$8 sps:$4 sm:$0xff]   ;;  %v1229_v38 = vld [vmem:[%s1324_s28 + $0xd0] ss:$8 sps:$4 sm:$0xff]   ;;  %v1232_v40 = vld [vmem:[%s1324_s28 + $0xe4] ss:$8 sps:$4 sm:$0xff]  }
  0x19   : > { %v1234_v41 = vld [vmem:[%s1324_s28 + $0x60] ss:$8 sps:$4 sm:$0xff]   ;;  %v1236_v43 = vld [vmem:[%s1324_s28 + $0x74] ss:$8 sps:$4 sm:$0xff]   ;;  %v1240_v45 = vld [vmem:[%s1324_s28 + $0x70] ss:$8 sps:$4 sm:$0xff]  }
  0x1a   : > { %551 = vmatpush1.bf16.msra.mxu0 %v1187_v4  ;;  %1151 = vmatpush1.bf16.msra.mxu1 %v1187_v4  ;;  %v1235_v42 = vld [vmem:[%s1324_s28 + $0xe0] ss:$8 sps:$4 sm:$0xff]   ;;  %v1238_v44 = vld [vmem:[%s1324_s28 + $0xf4] ss:$8 sps:$4 sm:$0xff]   ;;  %v1241_v46 = vld [vmem:[%s1324_s28 + $0xf0] ss:$8 sps:$4 sm:$0xff]  }
  0x1b   : > { %552 = vmatprep.subr.bf16.mxu0 %v1266_v1  ;;  %1142 = vmatprep.subr.bf16.mxu1 %v1266_v1  ;;  %v1395_v47 = vld [vmem:[%s1510_s2] ss:$0 sm:$0xff] }
  0x1e   : > { %553 = vmatpush1.bf16.msra.mxu0 %v1188_v5  ;;  %1152 = vmatpush1.bf16.msra.mxu1 %v1188_v5 }
  0x1f   : > { %554 = vmatprep.subr.bf16.mxu0 %v1266_v1  ;;  %1143 = vmatprep.subr.bf16.mxu1 %v1266_v1 }
  0x22   : > { %555 = vmatpush1.bf16.msra.mxu0 %v1189_v8  ;;  %1153 = vmatpush1.bf16.msra.mxu1 %v1189_v8 }
  0x23   : > { %556 = vmatprep.subr.bf16.mxu0 %v1266_v1  ;;  %1144 = vmatprep.subr.bf16.mxu1 %v1266_v1 }
  0x26   : > { %557 = vmatpush1.bf16.msra.mxu0 %v1190_v9  ;;  %1154 = vmatpush1.bf16.msra.mxu1 %v1190_v9 }
  0x27   : > { %558 = vmatprep.subr.bf16.mxu0 %v1266_v1  ;;  %1145 = vmatprep.subr.bf16.mxu1 %v1266_v1 }
  0x2a   : > { %559 = vmatpush1.bf16.msra.mxu0 %v1191_v12  ;;  %1155 = vmatpush1.bf16.msra.mxu1 %v1191_v12 }
  0x2b   : > { %572 = vmatprep.subr.bf16.mxu0 %v1266_v1  ;;  %1146 = vmatprep.subr.bf16.mxu1 %v1266_v1 }
  0x2e   : > { %573 = vmatpush2.bf16.msra.mxu0 %v542_v15  ;;  %1156 = vmatpush2.bf16.msra.mxu1 %v542_v15 }
  0x2f   : > { %574 = vmatprep.subr.bf16.mxu0 %v1266_v1  ;;  %1147 = vmatprep.subr.bf16.mxu1 %v1266_v1 }
  0x32   : > { %575 = vmatpush2.bf16.msra.mxu0 %v1193_v16  ;;  %1157 = vmatpush2.bf16.msra.mxu1 %v1193_v16 }
  0x35   : > { %577 = vmatmul.mubr.bf16.vlgmr.msra.gmra.mxu0 %v1194_v17  ;;  %641 = vmatmul.mubr.bf16.vlgmr.msra.gmra.mxu1 %v1197_v18 }
  0x36   : > { %1056 = vmatprep.mubr.msk.bf16.mxu0 %vm488_vm0, %v1200_v19  ;;  %1064 = vmatprep.mubr.msk.bf16.mxu1 %vm488_vm0, %v1202_v20 }
  0x3d   : > { %585 = vmatmul.mubr.bf16.gmra.mxu0 %v1204_v21  ;;  %649 = vmatmul.mubr.bf16.gmra.mxu1 %v1205_v22 }
  0x3e   : > { %1057 = vmatprep.mubr.msk.bf16.mxu0 %vm488_vm0, %v1206_v23  ;;  %1065 = vmatprep.mubr.msk.bf16.mxu1 %vm488_vm0, %v1208_v24 }
  0x45   : > { %593 = vmatmul.mubr.bf16.gmra.mxu0 %v1210_v25  ;;  %657 = vmatmul.mubr.bf16.gmra.mxu1 %v1211_v26 }
  0x46   : > { %1058 = vmatprep.mubr.msk.bf16.mxu0 %vm488_vm0, %v1212_v27  ;;  %1066 = vmatprep.mubr.msk.bf16.mxu1 %vm488_vm0, %v1214_v28 }
  0x4d   : > { %601 = vmatmul.mubr.bf16.gmra.mxu0 %v1216_v29  ;;  %665 = vmatmul.mubr.bf16.gmra.mxu1 %v1217_v30 }
  0x4e   : > { %1059 = vmatprep.mubr.msk.bf16.mxu0 %vm488_vm0, %v1218_v31  ;;  %1067 = vmatprep.mubr.msk.bf16.mxu1 %vm488_vm0, %v1220_v32 }
  0x55   : > { %609 = vmatmul.mubr.bf16.gmra.mxu0 %v1222_v33  ;;  %673 = vmatmul.mubr.bf16.gmra.mxu1 %v1223_v34 }
  0x56   : > { %1060 = vmatprep.mubr.msk.bf16.mxu0 %vm488_vm0, %v1224_v35  ;;  %1068 = vmatprep.mubr.msk.bf16.mxu1 %vm488_vm0, %v1226_v36 }
  0x5d   : > { %617 = vmatmul.mubr.bf16.gmra.mxu0 %v1228_v37  ;;  %681 = vmatmul.mubr.bf16.gmra.mxu1 %v1229_v38 }
  0x5e   : > { %1061 = vmatprep.mubr.msk.bf16.mxu0 %vm488_vm0, %v1230_v39  ;;  %1069 = vmatprep.mubr.msk.bf16.mxu1 %vm488_vm0, %v1232_v40 }
  0x65   : > { %625 = vmatmul.mubr.bf16.gmra.mxu0 %v1234_v41  ;;  %689 = vmatmul.mubr.bf16.gmra.mxu1 %v1235_v42 }
  0x66   : > { %1062 = vmatprep.mubr.msk.bf16.mxu0 %vm488_vm0, %v1236_v43  ;;  %1070 = vmatprep.mubr.msk.bf16.mxu1 %vm488_vm0, %v1238_v44 }
  0x6d   : > { %633 = vmatmul.mubr.bf16.gmra.mxu0 %v1240_v45  ;;  %697 = vmatmul.mubr.bf16.gmra.mxu1 %v1241_v46 }
  0xf5   : > { %v578_v48 = vpop.f32.mrf.mxu0  ;;  %v642_v49 = vpop.f32.mrf.mxu1 }
  0xf6   : > { %v579_v50 = vadd.f32 %v1395_v47, %v578_v48  ;;  %v643_v51 = vadd.f32 %v1395_v47, %v642_v49 }
  0xf7   : > { %v580_v52 = vpop.f32.mrf.mxu0  ;;  %v644_v53 = vpop.f32.mrf.mxu1 }
  0xf8   : > { %v705_v54 = vmax.f32 %v579_v50, 0.0  ;;  %v721_v55 = vmax.f32 %v643_v51, 0.0 }
  0xf9   : > { %v581_v56 = vpop.f32.mrf.mxu0  ;;  %v645_v57 = vpop.f32.mrf.mxu1 }
  0xfa   : > { %v1106_v58 = vpack.c.bf16 %v705_v54, %v705_v54  ;;  %v1122_v59 = vpack.c.bf16 %v721_v55, %v721_v55  ;;  %v582_v60 = vadd.f32 %v1395_v47, %v581_v56  ;;  %v646_v61 = vadd.f32 %v1395_v47, %v645_v57 }
  0xfb   : > { %v583_v62 = vpop.f32.mrf.mxu0  ;;  %v647_v63 = vpop.f32.mrf.mxu1 }
  0xfc   : > { %866 = vst.msk [vmem:[%s1403_s23] sm:$0xf] %vm865_vm3, %v1106_v58  ;;  %882 = vst.msk [vmem:[%s1403_s23 + $0x40] sm:$0xf] %vm865_vm3, %v1122_v59  ;;  %v706_v0 = vmax.f32 %v582_v60, 0.0  ;;  %v722_v1 = vmax.f32 %v646_v61, 0.0 }
  0xfd   : > { %v586_v2 = vpop.f32.mrf.mxu0  ;;  %v650_v3 = vpop.f32.mrf.mxu1 }
  0xfe   : > { %v1107_v4 = vpack.c.bf16 %v706_v0, %v706_v0  ;;  %v1123_v5 = vpack.c.bf16 %v722_v1, %v722_v1  ;;  %v587_v6 = vadd.f32 %v1395_v47, %v586_v2  ;;  %v651_v7 = vadd.f32 %v1395_v47, %v650_v3 }
  0xff   : > { %v588_v8 = vpop.f32.mrf.mxu0  ;;  %v652_v9 = vpop.f32.mrf.mxu1 }
 0x100   : > { %867 = vst.msk [vmem:[%s1403_s23 + $0x4] sm:$0xf] %vm865_vm3, %v1107_v4  ;;  %883 = vst.msk [vmem:[%s1403_s23 + $0x44] sm:$0xf] %vm865_vm3, %v1123_v5  ;;  %v707_v10 = vmax.f32 %v587_v6, 0.0  ;;  %v723_v11 = vmax.f32 %v651_v7, 0.0 }
 0x101   : > { %v589_v12 = vpop.f32.mrf.mxu0  ;;  %v653_v13 = vpop.f32.mrf.mxu1 }
 0x102   : > { %v1108_v14 = vpack.c.bf16 %v707_v10, %v707_v10  ;;  %v1124_v15 = vpack.c.bf16 %v723_v11, %v723_v11  ;;  %v590_v16 = vadd.f32 %v1395_v47, %v589_v12  ;;  %v654_v17 = vadd.f32 %v1395_v47, %v653_v13 }
 0x103   : > { %v591_v18 = vpop.f32.mrf.mxu0  ;;  %v655_v19 = vpop.f32.mrf.mxu1 }
 0x104   : > { %868 = vst.msk [vmem:[%s1403_s23 + $0x8] sm:$0xf] %vm865_vm3, %v1108_v14  ;;  %884 = vst.msk [vmem:[%s1403_s23 + $0x48] sm:$0xf] %vm865_vm3, %v1124_v15  ;;  %v708_v20 = vmax.f32 %v590_v16, 0.0  ;;  %v724_v21 = vmax.f32 %v654_v17, 0.0 }
 0x105   : > { %v594_v22 = vpop.f32.mrf.mxu0  ;;  %v658_v23 = vpop.f32.mrf.mxu1 }
 0x106   : > { %v1109_v24 = vpack.c.bf16 %v708_v20, %v708_v20  ;;  %v1125_v25 = vpack.c.bf16 %v724_v21, %v724_v21  ;;  %v595_v26 = vadd.f32 %v1395_v47, %v594_v22  ;;  %v659_v27 = vadd.f32 %v1395_v47, %v658_v23 }
 0x107   : > { %v596_v28 = vpop.f32.mrf.mxu0  ;;  %v660_v29 = vpop.f32.mrf.mxu1 }
 0x108   : > { %869 = vst.msk [vmem:[%s1403_s23 + $0xc] sm:$0xf] %vm865_vm3, %v1109_v24  ;;  %885 = vst.msk [vmem:[%s1403_s23 + $0x4c] sm:$0xf] %vm865_vm3, %v1125_v25  ;;  %v709_v30 = vmax.f32 %v595_v26, 0.0  ;;  %v725_v31 = vmax.f32 %v659_v27, 0.0 }
 0x109   : > { %v597_v32 = vpop.f32.mrf.mxu0  ;;  %v661_v33 = vpop.f32.mrf.mxu1 }
 0x10a   : > { %v1110_v34 = vpack.c.bf16 %v709_v30, %v709_v30  ;;  %v1126_v35 = vpack.c.bf16 %v725_v31, %v725_v31  ;;  %v598_v36 = vadd.f32 %v1395_v47, %v597_v32  ;;  %v662_v37 = vadd.f32 %v1395_v47, %v661_v33 }
 0x10b   : > { %v599_v38 = vpop.f32.mrf.mxu0  ;;  %v663_v39 = vpop.f32.mrf.mxu1 }
 0x10c   : > { %870 = vst.msk [vmem:[%s1403_s23 + $0x10] sm:$0xf] %vm865_vm3, %v1110_v34  ;;  %886 = vst.msk [vmem:[%s1403_s23 + $0x50] sm:$0xf] %vm865_vm3, %v1126_v35  ;;  %v710_v40 = vmax.f32 %v598_v36, 0.0  ;;  %v726_v41 = vmax.f32 %v662_v37, 0.0 }
 0x10d   : > { %v602_v42 = vpop.f32.mrf.mxu0  ;;  %v666_v43 = vpop.f32.mrf.mxu1 }
 0x10e   : > { %v1111_v44 = vpack.c.bf16 %v710_v40, %v710_v40  ;;  %v1127_v45 = vpack.c.bf16 %v726_v41, %v726_v41  ;;  %v603_v46 = vadd.f32 %v1395_v47, %v602_v42  ;;  %v667_v48 = vadd.f32 %v1395_v47, %v666_v43 }
 0x10f   : > { %v604_v49 = vpop.f32.mrf.mxu0  ;;  %v668_v50 = vpop.f32.mrf.mxu1 }
 0x110   : > { %871 = vst.msk [vmem:[%s1403_s23 + $0x14] sm:$0xf] %vm865_vm3, %v1111_v44  ;;  %887 = vst.msk [vmem:[%s1403_s23 + $0x54] sm:$0xf] %vm865_vm3, %v1127_v45  ;;  %v711_v51 = vmax.f32 %v603_v46, 0.0  ;;  %v727_v52 = vmax.f32 %v667_v48, 0.0 }
 0x111   : > { %v605_v53 = vpop.f32.mrf.mxu0  ;;  %v669_v54 = vpop.f32.mrf.mxu1 }
 0x112   : > { %v1112_v55 = vpack.c.bf16 %v711_v51, %v711_v51  ;;  %v1128_v56 = vpack.c.bf16 %v727_v52, %v727_v52  ;;  %v606_v57 = vadd.f32 %v1395_v47, %v605_v53  ;;  %v670_v58 = vadd.f32 %v1395_v47, %v669_v54 }
 0x113   : > { %v607_v59 = vpop.f32.mrf.mxu0  ;;  %v671_v60 = vpop.f32.mrf.mxu1 }
 0x114   : > { %872 = vst.msk [vmem:[%s1403_s23 + $0x18] sm:$0xf] %vm865_vm3, %v1112_v55  ;;  %888 = vst.msk [vmem:[%s1403_s23 + $0x58] sm:$0xf] %vm865_vm3, %v1128_v56  ;;  %v712_v61 = vmax.f32 %v606_v57, 0.0  ;;  %v728_v62 = vmax.f32 %v670_v58, 0.0 }
 0x115   : > { %v610_v63 = vpop.f32.mrf.mxu0  ;;  %v674_v0 = vpop.f32.mrf.mxu1 }
 0x116   : > { %v1113_v1 = vpack.c.bf16 %v712_v61, %v712_v61  ;;  %v1129_v2 = vpack.c.bf16 %v728_v62, %v728_v62  ;;  %v611_v3 = vadd.f32 %v1395_v47, %v610_v63  ;;  %v675_v4 = vadd.f32 %v1395_v47, %v674_v0 }
 0x117   : > { %v612_v5 = vpop.f32.mrf.mxu0  ;;  %v676_v6 = vpop.f32.mrf.mxu1 }
 0x118   : > { %873 = vst.msk [vmem:[%s1403_s23 + $0x1c] sm:$0xf] %vm865_vm3, %v1113_v1  ;;  %889 = vst.msk [vmem:[%s1403_s23 + $0x5c] sm:$0xf] %vm865_vm3, %v1129_v2  ;;  %v713_v7 = vmax.f32 %v611_v3, 0.0  ;;  %v729_v8 = vmax.f32 %v675_v4, 0.0 }
 0x119   : > { %v613_v9 = vpop.f32.mrf.mxu0  ;;  %v677_v10 = vpop.f32.mrf.mxu1 }
 0x11a   : > { %v1114_v11 = vpack.c.bf16 %v713_v7, %v713_v7  ;;  %v1130_v12 = vpack.c.bf16 %v729_v8, %v729_v8  ;;  %v614_v13 = vadd.f32 %v1395_v47, %v613_v9  ;;  %v678_v14 = vadd.f32 %v1395_v47, %v677_v10 }
 0x11b   : > { %v615_v15 = vpop.f32.mrf.mxu0  ;;  %v679_v16 = vpop.f32.mrf.mxu1 }
 0x11c   : > { %874 = vst.msk [vmem:[%s1403_s23 + $0x20] sm:$0xf] %vm865_vm3, %v1114_v11  ;;  %890 = vst.msk [vmem:[%s1403_s23 + $0x60] sm:$0xf] %vm865_vm3, %v1130_v12  ;;  %v714_v17 = vmax.f32 %v614_v13, 0.0  ;;  %v730_v18 = vmax.f32 %v678_v14, 0.0 }
 0x11d   : > { %v618_v19 = vpop.f32.mrf.mxu0  ;;  %v682_v20 = vpop.f32.mrf.mxu1 }
 0x11e   : > { %v1115_v21 = vpack.c.bf16 %v714_v17, %v714_v17  ;;  %v1131_v22 = vpack.c.bf16 %v730_v18, %v730_v18  ;;  %v619_v23 = vadd.f32 %v1395_v47, %v618_v19  ;;  %v683_v24 = vadd.f32 %v1395_v47, %v682_v20 }
 0x11f   : > { %v620_v25 = vpop.f32.mrf.mxu0  ;;  %v684_v26 = vpop.f32.mrf.mxu1 }
 0x120   : > { %875 = vst.msk [vmem:[%s1403_s23 + $0x24] sm:$0xf] %vm865_vm3, %v1115_v21  ;;  %891 = vst.msk [vmem:[%s1403_s23 + $0x64] sm:$0xf] %vm865_vm3, %v1131_v22  ;;  %v715_v27 = vmax.f32 %v619_v23, 0.0  ;;  %v731_v28 = vmax.f32 %v683_v24, 0.0 }
 0x121   : > { %v621_v29 = vpop.f32.mrf.mxu0  ;;  %v685_v30 = vpop.f32.mrf.mxu1 }
 0x122   : > { %v1116_v31 = vpack.c.bf16 %v715_v27, %v715_v27  ;;  %v1132_v32 = vpack.c.bf16 %v731_v28, %v731_v28  ;;  %v622_v33 = vadd.f32 %v1395_v47, %v621_v29  ;;  %v686_v34 = vadd.f32 %v1395_v47, %v685_v30 }
 0x123   : > { %v623_v35 = vpop.f32.mrf.mxu0  ;;  %v687_v36 = vpop.f32.mrf.mxu1 }
 0x124   : > { %876 = vst.msk [vmem:[%s1403_s23 + $0x28] sm:$0xf] %vm865_vm3, %v1116_v31  ;;  %892 = vst.msk [vmem:[%s1403_s23 + $0x68] sm:$0xf] %vm865_vm3, %v1132_v32  ;;  %v716_v37 = vmax.f32 %v622_v33, 0.0  ;;  %v732_v38 = vmax.f32 %v686_v34, 0.0 }
 0x125   : > { %v626_v39 = vpop.f32.mrf.mxu0  ;;  %v690_v40 = vpop.f32.mrf.mxu1 }
 0x126   : > { %v1117_v41 = vpack.c.bf16 %v716_v37, %v716_v37  ;;  %v1133_v42 = vpack.c.bf16 %v732_v38, %v732_v38  ;;  %v627_v43 = vadd.f32 %v1395_v47, %v626_v39  ;;  %v691_v44 = vadd.f32 %v1395_v47, %v690_v40 }
 0x127   : > { %v628_v45 = vpop.f32.mrf.mxu0  ;;  %v692_v46 = vpop.f32.mrf.mxu1 }
 0x128   : > { %877 = vst.msk [vmem:[%s1403_s23 + $0x2c] sm:$0xf] %vm865_vm3, %v1117_v41  ;;  %893 = vst.msk [vmem:[%s1403_s23 + $0x6c] sm:$0xf] %vm865_vm3, %v1133_v42  ;;  %v717_v48 = vmax.f32 %v627_v43, 0.0  ;;  %v733_v49 = vmax.f32 %v691_v44, 0.0 }
 0x129   : > { %v629_v50 = vpop.f32.mrf.mxu0  ;;  %v693_v51 = vpop.f32.mrf.mxu1 }
 0x12a   : > { %v1118_v52 = vpack.c.bf16 %v717_v48, %v717_v48  ;;  %v1134_v53 = vpack.c.bf16 %v733_v49, %v733_v49  ;;  %v630_v54 = vadd.f32 %v1395_v47, %v629_v50  ;;  %v694_v55 = vadd.f32 %v1395_v47, %v693_v51 }
 0x12b   : > { %v631_v56 = vpop.f32.mrf.mxu0  ;;  %v695_v57 = vpop.f32.mrf.mxu1 }
 0x12c   : > { %878 = vst.msk [vmem:[%s1403_s23 + $0x30] sm:$0xf] %vm865_vm3, %v1118_v52  ;;  %894 = vst.msk [vmem:[%s1403_s23 + $0x70] sm:$0xf] %vm865_vm3, %v1134_v53  ;;  %v718_v58 = vmax.f32 %v630_v54, 0.0  ;;  %v734_v59 = vmax.f32 %v694_v55, 0.0 }
 0x12d   : > { %v634_v60 = vpop.f32.mrf.mxu0  ;;  %v698_v61 = vpop.f32.mrf.mxu1 }
 0x12e   : > { %v1119_v62 = vpack.c.bf16 %v718_v58, %v718_v58  ;;  %v1135_v63 = vpack.c.bf16 %v734_v59, %v734_v59  ;;  %v635_v0 = vadd.f32 %v1395_v47, %v634_v60  ;;  %v699_v1 = vadd.f32 %v1395_v47, %v698_v61 }
 0x12f   : > { %v636_v2 = vpop.f32.mrf.mxu0  ;;  %v700_v3 = vpop.f32.mrf.mxu1 }
 0x130   : > { %879 = vst.msk [vmem:[%s1403_s23 + $0x34] sm:$0xf] %vm865_vm3, %v1119_v62  ;;  %895 = vst.msk [vmem:[%s1403_s23 + $0x74] sm:$0xf] %vm865_vm3, %v1135_v63  ;;  %v719_v4 = vmax.f32 %v635_v0, 0.0  ;;  %v735_v5 = vmax.f32 %v699_v1, 0.0 }
 0x131   : > { %v637_v6 = vpop.f32.mrf.mxu0  ;;  %v701_v7 = vpop.f32.mrf.mxu1 }
 0x132   : > { %v1120_v8 = vpack.c.bf16 %v719_v4, %v719_v4  ;;  %v1136_v9 = vpack.c.bf16 %v735_v5, %v735_v5  ;;  %v638_v10 = vadd.f32 %v1395_v47, %v637_v6  ;;  %v702_v11 = vadd.f32 %v1395_v47, %v701_v7 }
 0x133   : > { %v639_v12 = vpop.f32.mrf.mxu0  ;;  %v703_v13 = vpop.f32.mrf.mxu1 }
 0x134   : > { %880 = vst.msk [vmem:[%s1403_s23 + $0x38] sm:$0xf] %vm865_vm3, %v1120_v8  ;;  %896 = vst.msk [vmem:[%s1403_s23 + $0x78] sm:$0xf] %vm865_vm3, %v1136_v9  ;;  %v720_v14 = vmax.f32 %v638_v10, 0.0  ;;  %v736_v15 = vmax.f32 %v702_v11, 0.0 }
 0x136   : > { %v1121_v16 = vpack.c.bf16 %v720_v14, %v720_v14  ;;  %v1137_v17 = vpack.c.bf16 %v736_v15, %v736_v15 }
 0x138   : > { %881 = vst.msk [vmem:[%s1403_s23 + $0x3c] sm:$0xf] %vm865_vm3, %v1121_v16  ;;  %897 = vst.msk [vmem:[%s1403_s23 + $0x7c] sm:$0xf] %vm865_vm3, %v1137_v17 }
 0x139 PF: > { %s13_s14 = sadd.s32 1, %s1264_s14   ;;  %s1512_s12 = smov %s1260_s13 }
 0x13a   : > { %p10_p5 = scmp.ge.s32.totalorder %s13_s14, 4   ;;  %s1513_s13 = smov %s1515_s15 }
 0x13c   :  { %12 = sbr.rel (!%p10_p5) target bundleno = 2 (0x2), region = 68 }

</bundles_post_ra>
